<compile_context>
chip_gen: v7x
topology: tpu7x:2x2x1
jax: 0.10.0
libtpu: 0.0.40
codegen_flags: <defaults>
</compile_context>

<pallas_src>
import jax
import jax.numpy as jnp
import numpy as np
from jax.experimental import pallas as pl
from jax.experimental.pallas import tpu as pltpu


# --------------------------------- kernel ---------------------------------------
def _residual_block_kernel(alpha_ref, xcol_ref, w1_ref, w2_ref, b_ref, o_ref):
    """One (batch, HW-tile) block.

    alpha_ref : SMEM (1,)            PReLU slope
    xcol_ref  : VMEM (1, KKC, THW)   im2col of x; contraction rows, pixels on lanes
    w1_ref    : VMEM (C_out, KKC)    conv1 weight, (tap, c_in)-flattened columns
    w2_ref    : VMEM (C_out, KKC)    conv2 weight, (tap, c_in)-flattened columns
    b_ref     : VMEM (C_out, 1)      b1 + b2
    o_ref     : VMEM (1, C_out, THW) output tile (already NCHW-flat)
    """
    alpha = alpha_ref[0]
    x = xcol_ref[0]                                           # (KKC, THW) f32
    # PReLU once on the whole block (prelu(0) == 0, so zero-padding stays valid).
    xp = jnp.maximum(x, 0.0) + alpha * jnp.minimum(x, 0.0)
    acc = jnp.dot(w1_ref[...], x, preferred_element_type=jnp.float32)        # conv1(x)
    acc = acc + jnp.dot(w2_ref[...], xp, preferred_element_type=jnp.float32)  # conv2(prelu(x))
    o_ref[0] = (acc + b_ref[...]).astype(o_ref.dtype)


def _pick_hw_tile(HW, KKC, C_out, itemsize=4, vmem_budget=24 * 1024 * 1024):
    """Largest HW tile (HW itself, or a power-of-2 divisor that is a multiple of 128)
    whose double-buffered im2col + output blocks stay under a v7x-safe VMEM budget."""
    def block_bytes(t):
        return 2 * (KKC + C_out) * t * itemsize               # 2x: double-buffered
    t = HW
    while t % 256 == 0 and block_bytes(t) > vmem_budget:
        t //= 2
    return t


# --------------------------------- wrapper --------------------------------------
def residual_block_pallas(x_nchw, w1, b1, w2, b2, alpha, padding):
    """x_nchw: (N, C_in, H, W); w*: PyTorch (C_out, C_in, K, K); b*: (C_out,)."""
    N, C_in, H, W = x_nchw.shape
    C_h0, _, K, _ = w1.shape
    C_h1 = w2.shape[0]
    assert w2.shape[1] == C_in == C_h0, "forward requires in_channels == hidden[0]"
    assert C_h1 == C_h0, "residual add requires hidden[1] == hidden[0]"
    HW = H * W
    KKC = K * K * C_in

    # --- glue in plain JAX: spatial zero-pad + im2col of x only (NCHW-native) -----
    # Note: for large images the im2col (9x of x) could be dropped entirely by
    # passing the padded input and doing the K*K static tap slices in-kernel; at
    # these channel counts the (contraction, HW)-major layout below is the simpler
    # memory-bound-friendly choice.
    xpad = jnp.pad(x_nchw, ((0, 0), (0, 0), (padding, padding), (padding, padding)))
    taps = []
    for kh in range(K):
        for kw in range(K):
            taps.append(xpad[:, :, kh:kh + H, kw:kw + W].reshape(N, C_in, HW))
    xcol = jnp.concatenate(taps, axis=1).astype(jnp.float32)   # (N, K*K*C_in, HW)

    # weights: (C_out, C_in, K, K) -> (C_out, K*K*C_in); column order = (tap, c_in)
    w1_m = jnp.transpose(w1, (0, 2, 3, 1)).reshape(C_h0, KKC).astype(jnp.float32)
    w2_m = jnp.transpose(w2, (0, 2, 3, 1)).reshape(C_h1, KKC).astype(jnp.float32)
    # fold both biases (out = conv1 + b1 + conv2 + b2), per output channel
    b_m = (b1 + b2).reshape(C_h1, 1).astype(jnp.float32)
    alpha_m = jnp.asarray(alpha, jnp.float32).reshape(1,)

    THW = _pick_hw_tile(HW, KKC, C_h1)
    grid = (N, HW // THW)

    out_flat = pl.pallas_call(
        _residual_block_kernel,
        out_shape=jax.ShapeDtypeStruct((N, C_h1, HW), x_nchw.dtype),
        grid_spec=pltpu.PrefetchScalarGridSpec(
            num_scalar_prefetch=0,
            grid=grid,
            in_specs=[
                pl.BlockSpec(memory_space=pltpu.MemorySpace.SMEM),      # alpha (scalar)
                pl.BlockSpec((1, KKC, THW), lambda n, h: (n, 0, h)),    # im2col(x)
                pl.BlockSpec((C_h0, KKC), lambda n, h: (0, 0)),         # W1
                pl.BlockSpec((C_h1, KKC), lambda n, h: (0, 0)),         # W2
                pl.BlockSpec((C_h1, 1), lambda n, h: (0, 0)),           # b1 + b2
            ],
            out_specs=pl.BlockSpec((1, C_h1, THW), lambda n, h: (n, 0, h)),
        ),
        compiler_params=pltpu.CompilerParams(
            dimension_semantics=("parallel", "parallel")),
    )(alpha_m, xcol, w1_m, w2_m, b_m)

    # (N, C_out, H*W) is already NCHW-flat -- just restore the spatial dims.
    return out_flat.reshape(N, C_h1, H, W)


# --------------------------- pure-JAX reference ----------------------------------
def _conv_nchw(x, w, b, padding):
    out = jax.lax.conv_general_dilated(
        x, w, window_strides=(1, 1),
        padding=[(padding, padding), (padding, padding)],
        dimension_numbers=("NCHW", "OIHW", "NCHW"))
    return out + b.reshape(1, -1, 1, 1)


def residual_block_ref(x, w1, b1, w2, b2, alpha, padding):
    res = _conv_nchw(x, w1, b1, padding)
    xp = jnp.maximum(x, 0.0) + alpha * jnp.minimum(x, 0.0)
    out = _conv_nchw(xp, w2, b2, padding)
    return out + res


if __name__ == "__main__":
    # in_channels == hidden_channels[0] == hidden_channels[1] == 4, kernel 3, pad 1
    N, C, H, W, K, PAD = 2, 4, 16, 16, 3, 1
    key = jax.random.PRNGKey(0)
    kx, kw1, kb1, kw2, kb2 = jax.random.split(key, 5)

    x = jax.random.normal(kx, (N, C, H, W), dtype=jnp.float32)
    fan_in = C * K * K
    bound = 1.0 / np.sqrt(fan_in)
    w1 = jax.random.uniform(kw1, (C, C, K, K), jnp.float32, -bound, bound)
    b1 = jax.random.uniform(kb1, (C,), jnp.float32, -bound, bound)
    w2 = jax.random.uniform(kw2, (C, C, K, K), jnp.float32, -bound, bound)
    b2 = jax.random.uniform(kb2, (C,), jnp.float32, -bound, bound)
    alpha = jnp.float32(0.25)  # nn.PReLU() default init

    out = residual_block_pallas(x, w1, b1, w2, b2, alpha, PAD)
    out = jax.block_until_ready(out)

    ref = residual_block_ref(x, w1, b1, w2, b2, alpha, PAD)
    np.testing.assert_allclose(np.asarray(out), np.asarray(ref),
                               rtol=1e-3, atol=1e-3)
    print("KERNEL_OK")
</pallas_src>

<mosaic_0001>
module attributes {stable_mosaic.version = 11 : i64} {
  func.func @_residual_block_kernel(%arg0: i32, %arg1: i32, %arg2: memref<1xf32, #tpu.memory_space<smem>>, %arg3: memref<1x36x256xf32, #tpu.memory_space<vmem>>, %arg4: memref<4x36xf32, #tpu.memory_space<vmem>>, %arg5: memref<4x36xf32, #tpu.memory_space<vmem>>, %arg6: memref<4x1xf32, #tpu.memory_space<vmem>>, %arg7: memref<1x4x256xf32, #tpu.memory_space<vmem>>) attributes {dimension_semantics = [#tpu.dimension_semantics<parallel>, #tpu.dimension_semantics<parallel>], iteration_bounds = array<i64: 2, 1>, scalar_prefetch = 0 : i64, scratch_operands = 0 : i64, tpu.core_type = #tpu.core_type<tc>, window_params = [{transform_indices = @transform_0, window_bounds = array<i64: 1>}, {transform_indices = @transform_1, window_bounds = array<i64: 1, 36, 256>}, {pipeline_mode = #tpu.pipeline_mode<synchronous>, transform_indices = @transform_2, window_bounds = array<i64: 4, 36>}, {pipeline_mode = #tpu.pipeline_mode<synchronous>, transform_indices = @transform_3, window_bounds = array<i64: 4, 36>}, {pipeline_mode = #tpu.pipeline_mode<synchronous>, transform_indices = @transform_4, window_bounds = array<i64: 4, 1>}, {transform_indices = @transform_5, window_bounds = array<i64: 1, 4, 256>}]} {
    %c0 = arith.constant 0 : index
    %0 = memref.load %arg2[%c0] : memref<1xf32, #tpu.memory_space<smem>>
    %c0_0 = arith.constant 0 : index
    %c0_1 = arith.constant 0 : index
    %c0_2 = arith.constant 0 : index
    %1 = vector.load %arg3[%c0_0, %c0_1, %c0_2] : memref<1x36x256xf32, #tpu.memory_space<vmem>>, vector<1x36x256xf32>
    %2 = vector.shape_cast %1 : vector<1x36x256xf32> to vector<36x256xf32>
    %cst = arith.constant 0.000000e+00 : f32
    %3 = vector.broadcast %cst : f32 to vector<36x256xf32>
    %4 = arith.maximumf %2, %3 : vector<36x256xf32>
    %cst_3 = arith.constant 0.000000e+00 : f32
    %5 = vector.broadcast %cst_3 : f32 to vector<36x256xf32>
    %6 = arith.minimumf %2, %5 : vector<36x256xf32>
    %7 = vector.broadcast %0 : f32 to vector<36x256xf32>
    %8 = arith.mulf %7, %6 : vector<36x256xf32>
    %9 = arith.addf %4, %8 : vector<36x256xf32>
    %c0_4 = arith.constant 0 : index
    %c0_5 = arith.constant 0 : index
    %10 = vector.load %arg4[%c0_4, %c0_5] : memref<4x36xf32, #tpu.memory_space<vmem>>, vector<4x36xf32>
    %cst_6 = arith.constant dense<0.000000e+00> : vector<4x256xf32>
    %11 = tpu.matmul %10, %2, %cst_6 {dimension_numbers = #tpu.dot_dimension_numbers<[1], [0], [0], [1], [0, 0, 1, 1], [], []>} : vector<4x36xf32>, vector<36x256xf32>, vector<4x256xf32> -> vector<4x256xf32>
    %c0_7 = arith.constant 0 : index
    %c0_8 = arith.constant 0 : index
    %12 = vector.load %arg5[%c0_7, %c0_8] : memref<4x36xf32, #tpu.memory_space<vmem>>, vector<4x36xf32>
    %cst_9 = arith.constant dense<0.000000e+00> : vector<4x256xf32>
    %13 = tpu.matmul %12, %9, %cst_9 {dimension_numbers = #tpu.dot_dimension_numbers<[1], [0], [0], [1], [0, 0, 1, 1], [], []>} : vector<4x36xf32>, vector<36x256xf32>, vector<4x256xf32> -> vector<4x256xf32>
    %14 = arith.addf %11, %13 : vector<4x256xf32>
    %c0_10 = arith.constant 0 : index
    %c0_11 = arith.constant 0 : index
    %15 = vector.load %arg6[%c0_10, %c0_11] : memref<4x1xf32, #tpu.memory_space<vmem>>, vector<4x1xf32>
    %16 = vector.broadcast %15 : vector<4x1xf32> to vector<4x256xf32>
    %17 = arith.addf %14, %16 : vector<4x256xf32>
    %c0_12 = arith.constant 0 : index
    %c0_13 = arith.constant 0 : index
    %c0_14 = arith.constant 0 : index
    %18 = vector.load %arg7[%c0_12, %c0_13, %c0_14] : memref<1x4x256xf32, #tpu.memory_space<vmem>>, vector<1x4x256xf32>
    %19 = vector.shape_cast %18 : vector<1x4x256xf32> to vector<4x256xf32>
    %20 = vector.shape_cast %17 : vector<4x256xf32> to vector<1x4x256xf32>
    tpu.vector_store %arg7[%c0_12, %c0_13, %c0_14], %20 {strides = array<i32>} : memref<1x4x256xf32, #tpu.memory_space<vmem>>, vector<1x4x256xf32>,
    return
  }
  func.func @transform_0(%arg0: i32, %arg1: i32) -> i32 {
    %c0_i32 = arith.constant 0 : i32
    %c0_i32_0 = arith.constant 0 : i32
    return %c0_i32 : i32
  }
  func.func @transform_1(%arg0: i32, %arg1: i32) -> (i32, i32, i32) {
    %c0_i32 = arith.constant 0 : i32
    %c0_i32_0 = arith.constant 0 : i32
    return %arg0, %c0_i32, %arg1 : i32, i32, i32
  }
  func.func @transform_2(%arg0: i32, %arg1: i32) -> (i32, i32) {
    %c0_i32 = arith.constant 0 : i32
    %c0_i32_0 = arith.constant 0 : i32
    %c0_i32_1 = arith.constant 0 : i32
    return %c0_i32, %c0_i32_0 : i32, i32
  }
  func.func @transform_3(%arg0: i32, %arg1: i32) -> (i32, i32) {
    %c0_i32 = arith.constant 0 : i32
    %c0_i32_0 = arith.constant 0 : i32
    %c0_i32_1 = arith.constant 0 : i32
    return %c0_i32, %c0_i32_0 : i32, i32
  }
  func.func @transform_4(%arg0: i32, %arg1: i32) -> (i32, i32) {
    %c0_i32 = arith.constant 0 : i32
    %c0_i32_0 = arith.constant 0 : i32
    %c0_i32_1 = arith.constant 0 : i32
    return %c0_i32, %c0_i32_0 : i32, i32
  }
  func.func @transform_5(%arg0: i32, %arg1: i32) -> (i32, i32, i32) {
    %c0_i32 = arith.constant 0 : i32
    %c0_i32_0 = arith.constant 0 : i32
    return %arg0, %c0_i32, %arg1 : i32, i32, i32
  }
}

</mosaic_0001>

<bundles_post_ra>
// kernel: tpu_custom_call.1
= control target key start
LH: loop header
LB: loop body
LE: loop exit
PB: predicated region body
PF: predicated region fallthrough
CT: control target
= control target key end

     0   :  { %s926_s0 = inlined_call_operand.<no memory space> [shape: f32[1], index: 0, kind: input, shape index: {}]   ;;  %s927_s1 = inlined_call_operand.vmem [shape: f32[2,36,256], index: 1, kind: input, shape index: {}]   ;;  %s928_s2 = inlined_call_operand.vmem [shape: f32[4,36], index: 2, kind: input, shape index: {}]   ;;  %s929_s3 = inlined_call_operand.vmem [shape: f32[4,36], index: 3, kind: input, shape index: {}]   ;;  %s930_s4 = inlined_call_operand.vmem [shape: f32[4,1], index: 4, kind: input, shape index: {}]   ;;  %s931_s5 = inlined_call_operand.hbm [shape: f32[2,4,256], index: 5, kind: output, shape index: {}]  }
   0x1   :  { %10 = sst [smem:[#allocation2]] %s926_s0 }
   0x2   :  { %11 = vsyncpa [#allocation4], 0 }
   0x3   :  { %13 = vsyncpa [#allocation4 + $0x1], 0  ;;  %s789_s20 = smov 0   ;;  %s791_s21 = smov 0  }
   0x4   :  { %s793_s22 = smov 0   ;;  %s795_s23 = smov 0  }
   0x5   :  { %s797_s24 = smov 0   ;;  %s799_s25 = smov 0  }
   0x6 LB: > { %s577_s0 = sadd.s32 4294967295, %s751_s25   ;;  %s578_s26 = sadd.s32 4294967294, %s751_s25   ;;  %s751_s25 = sphi %s799_s25, %s19_s25   ;;  %s747_s24 = sphi %s797_s24, %s938_s24   ;;  %s743_s23 = sphi %s795_s23, %s937_s23   ;;  %s739_s22 = sphi %s793_s22, %s936_s22   ;;  %s735_s21 = sphi %s791_s21, %s935_s21   ;;  %s731_s20 = sphi %s789_s20, %s934_s20  }
   0x7   : > { %s31_s27 = sadd.s32 1, %s747_s24  ;;  %s152_s28 = sadd.s32 1, %s739_s22 }
   0x8   : > { %p33_p0 = scmp.ge.s32.totalorder %s31_s27, 2  ;;  %p162_p1 = scmp.ne.s32.totalorder %s739_s22, %s735_s21 }
   0x9   : > { %p163_p2 = scmp.eq.s32.totalorder %s577_s0, 1  ;;  %p168_p3 = scmp.ne.s32.totalorder %s735_s21, %s731_s20 }
   0xa   : > { %s940_s27 = smov (%p33_p0, %s31_s27), 0  ;;  %p169_p5 = scmp.eq.s32.totalorder %s578_s26, 1 }
   0xb   : > { %p829_p4 = por %p163_p2, %p162_p1  ;;  %s147_s30 = ssub.s32 %s747_s24, %s940_s27 }
   0xc   : > { %p581_p6 = scmp.ge.s32.totalorder %s751_s25, 1  ;;  %p150_p7 = scmp.eq.s32.totalorder %s147_s30, 0 }
   0xd   : > { %p836_p8 = por %p169_p5, %p168_p3  ;;  %p212_p9 = scmp.lt.s32.totalorder %s751_s25, 3 }
   0xe   : > { %s842_s7 = scalar_select %p150_p7, %s739_s22, %s152_s28  }
   0xf   : > { %p213_p10 = pnand %p581_p6, %p212_p9 }
  0x10   : > { %p245_p11 = scmp.lt.s32.totalorder (!%p213_p10), %s743_s23, 1  ;;  %s255_s8 = sld [smem:[#allocation2]] (!%p213_p10)  ;;  %v753_v0 = vmov (!%p213_p10), 0.0   ;;  %v754_v1 = vmov (!%p213_p10), 0   ;;  %v471_v2 = vld [vmem:[%s930_s4] sm:$0xf] (!%p213_p10) }
  0x11   : > { %216 = sbr.rel (%p213_p10) target bundleno = 282 (0x11a), region = 40  ;;  %464 = vmatprep.mubr.f32.mxu0 (!%p213_p10), %v753_v0  ;;  %384 = vmatprep.mubr.f32.mxu1 (!%p213_p10), %v753_v0  ;;  %vm313_vm0 = vcmask (!%p213_p10), 1043456   ;;  %v307_v59 = vld [vmem:[%s928_s2] sm:$0xf] (!%p213_p10)  ;;  %vm309_vm1 = vcmask (!%p213_p10), 293888   ;;  %s241_s0 = sand.u32 (!%p213_p10), 1, %s735_s21  }
  0x12   : > { %672 = vset.pattern.permute.xlu0 (!%p213_p10), %v754_v1  ;;  %v308_v63 = vld [vmem:[%s929_s3] sm:$0xf] (!%p213_p10)  ;;  %s582_s26 = sshll.u32 (!%p213_p10), %s241_s0, 3  ;;  %s595_s28 = sshll.u32 (!%p213_p10), %s743_s23, 7 }
  0x13   : > { %474 = vperm.xlu0 (!%p213_p10), %672, %v471_v2   ;;  %s243_s30 = scalar_lea.vmem (!%p213_p10), [#allocation3], %s582_s26  ;;  %s879_s11 = scalar_lea.hbm (!%p213_p10), %s931_s5, %s595_s28 }
  0x16   : > { %v286_v5 = vstv (!%p213_p10), %s255_s8  ;;  %s501_s8 = sshll.u32 (!%p213_p10), %s243_s30, 4  ;;  %s881_s8 = int_to_ptr.vmem [resolvable:$true] %s501_s8 }
  0x17   : > { %s673_s13 = scalar_lea.vmem (!%p213_p10), %s881_s8, 128 }
  0x18   : > { %s246_s9 = scalar_select %p245_p11, %s743_s23, 1 }
  0x19   : > { %p674_p12 = scmp.ne.s32.totalorder %s881_s8, %s673_s13  ;;  %s755_s23 = smov [#allocation3]  }
  0x1a   : > { %s614_s12 = smul.u32 80, %s246_s9  ;;  %s677_s14 = sshll.u32 %s755_s23, 4  ;;  %s678_s14 = int_to_ptr.vmem [resolvable:$false] %s677_s14 }
  0x1b   : > { %p675_p13 = pnand %p674_p12, %p829_p4  ;;  %p680_p1 = scmp.lt.s32.totalorder %s881_s8, %s678_s14 }
  0x1c   : > { %s852_s15 = scalar_lea.vmem %s927_s1, %s614_s12  ;;  %s485_s12 = scalar_lea.sflag [#allocation4], %s241_s0 }
  0x1d   : > { %v257_v3 = vld [vmem:[%s852_s15 + $0x8] sm:$0xff]  ;;  %v259_v4 = vld [vmem:[%s852_s15 + $0x18] sm:$0xff]  ;;  %v256_v6 = vld [vmem:[%s852_s15] sm:$0xff]  ;;  %p676_p0 = pneg %p675_p13 }
  0x1e   : > { %v277_v7 = vmin.f32 %v257_v3, 0.0  ;;  %v279_v8 = vmin.f32 %v259_v4, 0.0  ;;  %v604_v9 = vpack.c.bf16 %v259_v4, %v257_v3  ;;  %v267_v10 = vmax.f32 %v257_v3, 0.0  ;;  %v258_v11 = vld [vmem:[%s852_s15 + $0x10] sm:$0xff]  ;;  %v261_v12 = vld [vmem:[%s852_s15 + $0x28] sm:$0xff]  ;;  %v263_v13 = vld [vmem:[%s852_s15 + $0x38] sm:$0xff] }
  0x1f   : > { %v269_v14 = vmax.f32 %v259_v4, 0.0  ;;  %v276_v15 = vmin.f32 %v256_v6, 0.0  ;;  %v278_v16 = vmin.f32 %v258_v11, 0.0  ;;  %v606_v17 = vpack.c.bf16 %v258_v11, %v256_v6  ;;  %v260_v26 = vld [vmem:[%s852_s15 + $0x20] sm:$0xff]  ;;  %v262_v27 = vld [vmem:[%s852_s15 + $0x30] sm:$0xff] }
  0x20   : > { %605 = vmatprep.subr.bf16.mxu0 %v604_v9  ;;  %v288_v18 = vmul.f32 %v286_v5, %v277_v7  ;;  %v290_v19 = vmul.f32 %v286_v5, %v279_v8  ;;  %v266_v20 = vmax.f32 %v256_v6, 0.0  ;;  %v268_v21 = vmax.f32 %v258_v11, 0.0  ;;  %v265_v40 = vld [vmem:[%s852_s15 + $0x48] sm:$0xf]  ;;  %v264_v41 = vld [vmem:[%s852_s15 + $0x40] sm:$0xf] }
  0x21   : > { %607 = vmatpush1.bf16.msra.mxu0 %v606_v17  ;;  %v287_v22 = vmul.f32 %v286_v5, %v276_v15  ;;  %v289_v23 = vmul.f32 %v286_v5, %v278_v16  ;;  %v281_v24 = vmin.f32 %v261_v12, 0.0  ;;  %v283_v25 = vmin.f32 %v263_v13, 0.0  ;;  %s679_s15 = scalar_lea.vmem %s678_s14, 256 }
  0x22   : > { %v298_v28 = vadd.f32 %v288_v18, %v267_v10  ;;  %v300_v29 = vadd.f32 %v290_v19, %v269_v14  ;;  %v608_v30 = vpack.c.bf16 %v263_v13, %v261_v12  ;;  %v271_v31 = vmax.f32 %v261_v12, 0.0  ;;  %p681_p2 = scmp.lt.s32.totalorder %s679_s15, %s673_s13 }
  0x23   : > { %v297_v32 = vadd.f32 %v287_v22, %v266_v20  ;;  %v299_v33 = vadd.f32 %v289_v23, %v268_v21  ;;  %v273_v34 = vmax.f32 %v263_v13, 0.0  ;;  %v292_v35 = vmul.f32 %v286_v5, %v281_v24 }
  0x24   : > { %v596_v36 = vpack.c.bf16 %v300_v29, %v298_v28  ;;  %609 = vmatprep.subr.bf16.mxu0 %v608_v30  ;;  %v294_v37 = vmul.f32 %v286_v5, %v283_v25  ;;  %v280_v38 = vmin.f32 %v260_v26, 0.0  ;;  %v282_v39 = vmin.f32 %v262_v27, 0.0  ;;  %p682_p3 = por %p681_p2, %p680_p1 }
  0x25   : > { %v598_v42 = vpack.c.bf16 %v299_v33, %v297_v32  ;;  %v302_v43 = vadd.f32 %v292_v35, %v271_v31  ;;  %v610_v44 = vpack.c.bf16 %v262_v27, %v260_v26  ;;  %v270_v45 = vmax.f32 %v260_v26, 0.0 }
  0x26   : > { %597 = vmatprep.subr.bf16.mxu1 %v596_v36  ;;  %v304_v46 = vadd.f32 %v294_v37, %v273_v34  ;;  %v272_v47 = vmax.f32 %v262_v27, 0.0  ;;  %v291_v48 = vmul.f32 %v286_v5, %v280_v38  ;;  %v293_v49 = vmul.f32 %v286_v5, %v282_v39  ;;  %p683_p5 = pnand %p682_p3, %p676_p0 }
  0x27   : > { %599 = vmatpush1.bf16.msra.mxu1 %v598_v42  ;;  %611 = vmatpush1.bf16.msra.mxu0 %v610_v44  ;;  %v275_v50 = vmax.f32 %v265_v40, 0.0  ;;  %v285_v51 = vmin.f32 %v265_v40, 0.0  ;;  %v284_v52 = vmin.f32 %v264_v41, 0.0  ;;  %v274_v56 = vmax.f32 %v264_v41, 0.0 }
  0x28   : > { %v600_v53 = vpack.c.bf16 %v304_v46, %v302_v43  ;;  %v301_v54 = vadd.f32 %v291_v48, %v270_v45  ;;  %v303_v55 = vadd.f32 %v293_v49, %v272_v47  ;;  %587 = vmatprep.subr.msk.mxu0 %vm313_vm0, %v265_v40 }
  0x29   : > { %v296_v57 = vmul.f32 %v286_v5, %v285_v51  ;;  %v295_v58 = vmul.f32 %v286_v5, %v284_v52 }
  0x2a   : > { %601 = vmatprep.subr.bf16.mxu1 %v600_v53  ;;  %v602_v60 = vpack.c.bf16 %v303_v55, %v301_v54 }
  0x2b   : > { %v306_v61 = vadd.f32 %v296_v57, %v275_v50  ;;  %588 = vmatpush1.msk.msra.mxu0 %vm313_vm0, %v264_v41  ;;  %v305_v62 = vadd.f32 %v295_v58, %v274_v56 }
  0x2c   : > { %603 = vmatpush1.bf16.msra.mxu1 %v602_v60  ;;  %589 = vmatmul.mubr.msk.f32.vlgmr.msra.gmra.mrb[0].mxu0 %vm309_vm1, %v307_v59 }
  0x2d   : > { %584 = vmatprep.subr.msk.mxu1 %vm313_vm0, %v306_v61 }
  0x30   : > { %585 = vmatpush1.msk.msra.mxu1 %vm313_vm0, %v305_v62 }
  0x31   : > { %586 = vmatmul.mubr.msk.f32.vlgmr.msra.gmra.mrb[0].mxu1 %vm309_vm1, %v308_v63 }
  0x92   : > { %v475_v3 = vpop.permute.xlu0 %474 }
  0xff   : > { %v466_v0 = vpop.f32.mrb[0].mxu0 }
 0x100   : > { %v468_v1 = vpop.f32.mrb[1].mxu0 }
 0x104   : > { %v386_v2 = vpop.f32.mrb[0].mxu1 }
 0x105   : > { %v467_v4 = vadd.f32 %v466_v0, %v386_v2  ;;  %v388_v5 = vpop.f32.mrb[1].mxu1 }
 0x106   : > { %v469_v6 = vadd.f32 %v468_v1, %v388_v5 }
 0x107   : > { %v477_v7 = vadd.f32 %v475_v3, %v467_v4 }
 0x108   : > { %v478_v8 = vadd.f32 %v475_v3, %v469_v6 }
 0x10a   : > { %v481_v9 = vcombine.low %v477_v7, %v478_v8 }
 0x10c   : > { %483 = vst [vmem:[%s243_s30] sm:$0xff] %v481_v9 }
 0x10d   : > { %686 = shalt.err (!%p683_p5)
}
 0x10e   : > { %s687_s16 = scalar_lea.hbm %s879_s11, 128  ;;  %s691_s19 = scalar_lea.hbm %s931_s5, 256 }
 0x10f   : > { %p688_p6 = scmp.ne.s32.totalorder %s879_s11, %s687_s16  ;;  %p692_p10 = scmp.lt.u32.totalorder %s879_s11, %s931_s5 }
 0x110   : > { %p693_p11 = scmp.lt.u32.totalorder %s691_s19, %s687_s16  ;;  %p695_p13 = scmp.lt.u32.totalorder %s687_s16, %s879_s11 }
 0x111   : > { %p689_p7 = pnand %p688_p6, %p829_p4 }
 0x112   : > { %p694_p12 = por %p693_p11, %p692_p10 }
 0x113   : > { %p690_p9 = pneg %p689_p7 }
 0x114   : > { %p696_p0 = por %p695_p13, %p694_p12 }
 0x116   : > { %p697_p1 = pnand %p696_p0, %p690_p9 }
 0x118   : > { %700 = shalt.err (!%p697_p1)
}
 0x119   : > { %615 = dma.vmem_to_hbm [thread:$0]  (%p829_p4), %s881_s8, 128, %s879_s11, %s485_s12  }
 0x11a PF: > { %p621_p2 = scmp.ge.s32.totalorder %s751_s25, 2  ;;  %s513_s28 = sand.u32 1, %s731_s20  }
 0x11b   : > { %s514_s30 = scalar_lea.sflag [#allocation4], %s513_s28 }
 0x11c   : > { %p618_p3 = pnand %p621_p2, %p836_p8 }
 0x11e   : > { %726 = dma.done.wait (!%p618_p3), %s514_s30, 128  }
 0x11f   : > { %728 = vsyncadd (!%p618_p3), %s514_s30, 4294967168  ;;  %s19_s25 = sadd.s32 1, %s751_s25   ;;  %s934_s20 = smov %s735_s21 }
 0x120   : > { %p16_p5 = scmp.ge.s32.totalorder %s19_s25, 4   ;;  %s935_s21 = smov %s739_s22 }
 0x121   : > { %s936_s22 = smov %s842_s7  ;;  %s937_s23 = smov %s747_s24 }
 0x122   : > { %s938_s24 = smov %s940_s27  ;;  %18 = sbr.rel (!%p16_p5) target bundleno = 6 (0x6), region = 75 }
 0x129   :  { %519 = vsyncpa [#allocation4], 1 }
 0x12a   :  { %521 = vsyncpa [#allocation4 + $0x1], 1 }

</bundles_post_ra>
